<compile_context>
chip_gen: v7x
topology: tpu7x:2x2x1
jax: 0.10.0
libtpu: 0.0.40
codegen_flags: <defaults>
</compile_context>

<pallas_src>
import jax
import jax.numpy as jnp
from jax.experimental import pallas as pl
from jax.experimental.pallas import tpu as pltpu

IMAGE_SIZE = 784                 # global `image_size` in the reference (28*28)
INTERMEDIATE_DIM = 512
LATENT_DIM = 2
MAX_BATCH_TILE = 1024            # rows per grid step (amortizes per-step overhead)


def _round_up(n, m):
    return ((n + m - 1) // m) * m


def _choose_tiles(batch):
    """Pick (tile_rows, num_tiles, padded_batch).

    >=2 grid steps whenever the 8-padded batch allows it (v7x has 2 TCs and
    dimension_semantics=("parallel",) needs >1 step to shard), tiles capped at
    MAX_BATCH_TILE for huge batches.
    """
    b_pad = _round_up(max(batch, 1), 8)
    n_tiles = max(1, -(-b_pad // MAX_BATCH_TILE))
    if n_tiles == 1 and b_pad >= 16:
        n_tiles = 2
    tb = _round_up(-(-b_pad // n_tiles), 8)
    return tb, n_tiles, tb * n_tiles


def decoder_kernel(x_ref, w1_ref, b1_ref, w2_ref, b2_ref, o_ref):
    x = x_ref[...]                                   # (tb, latent)   f32

    # ---- fc1 + ReLU: K=2 contraction as VPU broadcast-FMAs (MXU left free) ----
    h = b1_ref[...]                                  # (1, inter) broadcasts up
    for k in range(LATENT_DIM):                      # static unroll (latent_dim=2)
        h = h + x[:, k:k + 1] * w1_ref[k:k + 1, :]   # (tb,1)*(1,inter) -> (tb,inter)
    h = jnp.maximum(h, 0.0)

    # ---- fc2: bf16 x bf16 on the MXU, f32 accumulation ----
    logits = jnp.dot(h.astype(jnp.bfloat16), w2_ref[...],
                     preferred_element_type=jnp.float32) + b2_ref[...]

    # ---- sigmoid via tanh (EUP slot, no VALU divide); cast to output dtype ----
    o_ref[...] = (0.5 * jnp.tanh(0.5 * logits) + 0.5).astype(o_ref.dtype)


def decoder_forward(x, w1_t, b1, w2_t, b2, out_dtype=jnp.float32):
    """x: (B, latent). w1_t: (latent, inter). w2_t: (inter, 784) -- ideally
    pre-cast to bf16 once by the caller. Returns (B, 784) in `out_dtype`
    (f32 default; pass jnp.bfloat16 to halve the HBM writeback if downstream
    accepts bf16 pixels)."""
    B, latent = x.shape
    inter = w1_t.shape[1]
    assert w2_t.shape == (inter, IMAGE_SIZE)

    # Cast is a trace-time no-op when the caller already stores w2 as bf16.
    if w2_t.dtype != jnp.bfloat16:
        w2_t = w2_t.astype(jnp.bfloat16)

    tb, n_tiles, b_pad = _choose_tiles(B)
    if b_pad != B:                                   # tiny: 8 bytes/row of input
        x = jnp.pad(x, ((0, b_pad - B), (0, 0)))

    out = pl.pallas_call(
        decoder_kernel,
        out_shape=jax.ShapeDtypeStruct((b_pad, IMAGE_SIZE), out_dtype),
        grid_spec=pltpu.PrefetchScalarGridSpec(
            num_scalar_prefetch=0,
            grid=(n_tiles,),
            in_specs=[
                pl.BlockSpec((tb, latent), lambda i: (i, 0)),          # x: batch-tiled
                pl.BlockSpec((latent, inter), lambda i: (0, 0)),       # w1 resident
                pl.BlockSpec((1, inter), lambda i: (0, 0)),            # b1 resident
                pl.BlockSpec((inter, IMAGE_SIZE), lambda i: (0, 0)),   # w2 (bf16) resident
                pl.BlockSpec((1, IMAGE_SIZE), lambda i: (0, 0)),       # b2 resident
            ],
            # Full-width 784 output block (== array dim) -> no pad bytes and no
            # post-kernel lane slice; last vreg group per row is a masked vst.
            out_specs=pl.BlockSpec((tb, IMAGE_SIZE), lambda i: (i, 0)),
        ),
        compiler_params=pltpu.CompilerParams(
            dimension_semantics=("parallel",),       # shard batch tiles across TCs (v7x)
            vmem_limit_bytes=32 * 1024 * 1024,       # explicit (v5e scoped default is 16 MiB)
        ),
    )(x, w1_t, b1, w2_t, b2)

    # Row slice only for ragged batches (no-op copy avoided when B % tile == 0).
    return out if b_pad == B else out[:B]


def init_params(key):
    """Deterministic init mimicking torch.nn.Linear default U[-1/sqrt(fan_in), 1/sqrt(fan_in)].
    Weights are stored pre-transposed as (in_features, out_features)."""
    k1, k2, k3, k4 = jax.random.split(key, 4)
    bound1 = 1.0 / jnp.sqrt(LATENT_DIM)
    bound2 = 1.0 / jnp.sqrt(INTERMEDIATE_DIM)
    w1_t = jax.random.uniform(k1, (LATENT_DIM, INTERMEDIATE_DIM), jnp.float32,
                              minval=-bound1, maxval=bound1)
    b1 = jax.random.uniform(k2, (1, INTERMEDIATE_DIM), jnp.float32,
                            minval=-bound1, maxval=bound1)
    w2_t = jax.random.uniform(k3, (INTERMEDIATE_DIM, IMAGE_SIZE), jnp.float32,
                              minval=-bound2, maxval=bound2)
    b2 = jax.random.uniform(k4, (1, IMAGE_SIZE), jnp.float32,
                            minval=-bound2, maxval=bound2)
    return w1_t, b1, w2_t, b2


def reference_forward(x, w1_t, b1, w2_t, b2):
    """Full-f32 reference matching the PyTorch module semantics."""
    h = jnp.maximum(x @ w1_t + b1, 0.0)
    return jax.nn.sigmoid(h @ w2_t + b2)


if __name__ == "__main__":
    key = jax.random.PRNGKey(0)
    kx, kp = jax.random.split(key)
    w1_t, b1, w2_t, b2 = init_params(kp)

    # Hoisted one-time weight prep (feedback #5): store fc2 weight as bf16.
    w2_bf16 = w2_t.astype(jnp.bfloat16)

    # ---- small primary check (B=8, single grid step, no padding/slicing) ----
    B = 8
    x = jax.random.normal(kx, (B, LATENT_DIM), jnp.float32)
    out = jax.block_until_ready(decoder_forward(x, w1_t, b1, w2_bf16, b2))
    ref = reference_forward(x, w1_t, b1, w2_t, b2)
    assert out.shape == (B, IMAGE_SIZE) and out.dtype == jnp.float32, (out.shape, out.dtype)
    # Tolerance vs f32 reference: fc2 uses bf16 operands (f32 accumulation).
    assert jnp.allclose(out, ref, atol=1e-2, rtol=0.0), float(jnp.max(jnp.abs(out - ref)))

    # ---- ragged multi-tile check (exercises batch pad + 2 parallel steps + row slice) ----
    B2 = 20
    x2 = jax.random.normal(jax.random.fold_in(kx, 1), (B2, LATENT_DIM), jnp.float32)
    out2 = jax.block_until_ready(decoder_forward(x2, w1_t, b1, w2_bf16, b2))
    ref2 = reference_forward(x2, w1_t, b1, w2_t, b2)
    assert out2.shape == (B2, IMAGE_SIZE), out2.shape
    assert jnp.allclose(out2, ref2, atol=1e-2, rtol=0.0), float(jnp.max(jnp.abs(out2 - ref2)))

    # ---- optional bf16-output path (halved writeback; feedback #2) ----
    out3 = jax.block_until_ready(
        decoder_forward(x, w1_t, b1, w2_bf16, b2, out_dtype=jnp.bfloat16))
    assert out3.dtype == jnp.bfloat16
    assert jnp.allclose(out3.astype(jnp.float32), ref, atol=2e-2, rtol=0.0), \
        float(jnp.max(jnp.abs(out3.astype(jnp.float32) - ref)))

    print("KERNEL_OK")
</pallas_src>

<mosaic_0001>
module attributes {stable_mosaic.version = 11 : i64} {
  func.func @decoder_kernel(%arg0: i32, %arg1: memref<8x2xf32, #tpu.memory_space<vmem>>, %arg2: memref<2x512xf32, #tpu.memory_space<vmem>>, %arg3: memref<1x512xf32, #tpu.memory_space<vmem>>, %arg4: memref<512x784xbf16, #tpu.memory_space<vmem>>, %arg5: memref<1x784xf32, #tpu.memory_space<vmem>>, %arg6: memref<8x784xf32, #tpu.memory_space<vmem>>) attributes {dimension_semantics = [#tpu.dimension_semantics<parallel>], iteration_bounds = array<i64: 1>, scalar_prefetch = 0 : i64, scratch_operands = 0 : i64, tpu.core_type = #tpu.core_type<tc>, window_params = [{transform_indices = @transform_0, window_bounds = array<i64: 8, 2>}, {pipeline_mode = #tpu.pipeline_mode<synchronous>, transform_indices = @transform_1, window_bounds = array<i64: 2, 512>}, {pipeline_mode = #tpu.pipeline_mode<synchronous>, transform_indices = @transform_2, window_bounds = array<i64: 1, 512>}, {pipeline_mode = #tpu.pipeline_mode<synchronous>, transform_indices = @transform_3, window_bounds = array<i64: 512, 784>}, {pipeline_mode = #tpu.pipeline_mode<synchronous>, transform_indices = @transform_4, window_bounds = array<i64: 1, 784>}, {transform_indices = @transform_5, window_bounds = array<i64: 8, 784>}]} {
    %c0 = arith.constant 0 : index
    %c0_0 = arith.constant 0 : index
    %0 = vector.load %arg1[%c0, %c0_0] : memref<8x2xf32, #tpu.memory_space<vmem>>, vector<8x2xf32>
    %c0_1 = arith.constant 0 : index
    %c0_2 = arith.constant 0 : index
    %1 = vector.load %arg3[%c0_1, %c0_2] : memref<1x512xf32, #tpu.memory_space<vmem>>, vector<1x512xf32>
    %2 = vector.extract_strided_slice %0 {offsets = [0, 0], sizes = [8, 1], strides = [1, 1]} : vector<8x2xf32> to vector<8x1xf32>
    %c0_3 = arith.constant 0 : index
    %c0_4 = arith.constant 0 : index
    %3 = vector.load %arg2[%c0_3, %c0_4] : memref<2x512xf32, #tpu.memory_space<vmem>>, vector<1x512xf32>
    %4 = vector.broadcast %2 : vector<8x1xf32> to vector<8x512xf32>
    %5 = vector.broadcast %3 : vector<1x512xf32> to vector<8x512xf32>
    %6 = arith.mulf %4, %5 : vector<8x512xf32>
    %7 = vector.broadcast %1 : vector<1x512xf32> to vector<8x512xf32>
    %8 = arith.addf %7, %6 : vector<8x512xf32>
    %9 = vector.extract_strided_slice %0 {offsets = [0, 1], sizes = [8, 1], strides = [1, 1]} : vector<8x2xf32> to vector<8x1xf32>
    %c1 = arith.constant 1 : index
    %c0_5 = arith.constant 0 : index
    %10 = vector.load %arg2[%c1, %c0_5] : memref<2x512xf32, #tpu.memory_space<vmem>>, vector<1x512xf32>
    %11 = vector.broadcast %9 : vector<8x1xf32> to vector<8x512xf32>
    %12 = vector.broadcast %10 : vector<1x512xf32> to vector<8x512xf32>
    %13 = arith.mulf %11, %12 : vector<8x512xf32>
    %14 = arith.addf %8, %13 : vector<8x512xf32>
    %cst = arith.constant 0.000000e+00 : f32
    %15 = vector.broadcast %cst : f32 to vector<8x512xf32>
    %16 = arith.maximumf %14, %15 : vector<8x512xf32>
    %17 = arith.truncf %16 : vector<8x512xf32> to vector<8x512xbf16>
    %c0_6 = arith.constant 0 : index
    %c0_7 = arith.constant 0 : index
    %18 = vector.load %arg4[%c0_6, %c0_7] : memref<512x784xbf16, #tpu.memory_space<vmem>>, vector<512x784xbf16>
    %cst_8 = arith.constant dense<0.000000e+00> : vector<8x784xf32>
    %19 = tpu.matmul %17, %18, %cst_8 {dimension_numbers = #tpu.dot_dimension_numbers<[1], [0], [0], [1], [0, 0, 1, 1], [], []>} : vector<8x512xbf16>, vector<512x784xbf16>, vector<8x784xf32> -> vector<8x784xf32>
    %c0_9 = arith.constant 0 : index
    %c0_10 = arith.constant 0 : index
    %20 = vector.load %arg5[%c0_9, %c0_10] : memref<1x784xf32, #tpu.memory_space<vmem>>, vector<1x784xf32>
    %21 = vector.broadcast %20 : vector<1x784xf32> to vector<8x784xf32>
    %22 = arith.addf %19, %21 : vector<8x784xf32>
    %cst_11 = arith.constant 5.000000e-01 : f32
    %23 = vector.broadcast %cst_11 : f32 to vector<8x784xf32>
    %24 = arith.mulf %23, %22 : vector<8x784xf32>
    %25 = math.tanh %24 : vector<8x784xf32>
    %cst_12 = arith.constant 5.000000e-01 : f32
    %26 = vector.broadcast %cst_12 : f32 to vector<8x784xf32>
    %27 = arith.mulf %26, %25 : vector<8x784xf32>
    %cst_13 = arith.constant 5.000000e-01 : f32
    %28 = vector.broadcast %cst_13 : f32 to vector<8x784xf32>
    %29 = arith.addf %27, %28 : vector<8x784xf32>
    %c0_14 = arith.constant 0 : index
    %c0_15 = arith.constant 0 : index
    %30 = vector.load %arg6[%c0_14, %c0_15] : memref<8x784xf32, #tpu.memory_space<vmem>>, vector<8x784xf32>
    tpu.vector_store %arg6[%c0_14, %c0_15], %29 {strides = array<i32>} : memref<8x784xf32, #tpu.memory_space<vmem>>, vector<8x784xf32>,
    return
  }
  func.func @transform_0(%arg0: i32) -> (i32, i32) {
    %c0_i32 = arith.constant 0 : i32
    %c0_i32_0 = arith.constant 0 : i32
    return %arg0, %c0_i32 : i32, i32
  }
  func.func @transform_1(%arg0: i32) -> (i32, i32) {
    %c0_i32 = arith.constant 0 : i32
    %c0_i32_0 = arith.constant 0 : i32
    %c0_i32_1 = arith.constant 0 : i32
    return %c0_i32, %c0_i32_0 : i32, i32
  }
  func.func @transform_2(%arg0: i32) -> (i32, i32) {
    %c0_i32 = arith.constant 0 : i32
    %c0_i32_0 = arith.constant 0 : i32
    %c0_i32_1 = arith.constant 0 : i32
    return %c0_i32, %c0_i32_0 : i32, i32
  }
  func.func @transform_3(%arg0: i32) -> (i32, i32) {
    %c0_i32 = arith.constant 0 : i32
    %c0_i32_0 = arith.constant 0 : i32
    %c0_i32_1 = arith.constant 0 : i32
    return %c0_i32, %c0_i32_0 : i32, i32
  }
  func.func @transform_4(%arg0: i32) -> (i32, i32) {
    %c0_i32 = arith.constant 0 : i32
    %c0_i32_0 = arith.constant 0 : i32
    %c0_i32_1 = arith.constant 0 : i32
    return %c0_i32, %c0_i32_0 : i32, i32
  }
  func.func @transform_5(%arg0: i32) -> (i32, i32) {
    %c0_i32 = arith.constant 0 : i32
    %c0_i32_0 = arith.constant 0 : i32
    return %arg0, %c0_i32 : i32, i32
  }
}

</mosaic_0001>

<bundles_post_ra>
// kernel: tpu_custom_call.1
= control target key start
LH: loop header
LB: loop body
LE: loop exit
PB: predicated region body
PF: predicated region fallthrough
CT: control target
= control target key end

     0   :  { %v2594_v1 = vmov 0   ;;  %v2595_v10 = vmov 1   ;;  %s3395_s0 = inlined_call_operand.vmem [shape: f32[8,2], index: 0, kind: input, shape index: {}]   ;;  %s3396_s1 = inlined_call_operand.vmem [shape: f32[2,512], index: 1, kind: input, shape index: {}]   ;;  %s3397_s2 = inlined_call_operand.vmem [shape: f32[1,512], index: 2, kind: input, shape index: {}]   ;;  %s3398_s3 = inlined_call_operand.vmem [shape: bf16[512,784], index: 3, kind: input, shape index: {}]   ;;  %s3399_s4 = inlined_call_operand.vmem [shape: f32[1,784], index: 4, kind: input, shape index: {}]   ;;  %s3400_s5 = inlined_call_operand.hbm [shape: f32[8,784], index: 5, kind: output, shape index: {}]  }
   0x1   :  { %v22_v0 = vld [vmem:[%s3395_s0] sm:$0xff]  ;;  %2234 = vset.pattern.permute.xlu0 %v2594_v1  ;;  %v2238_v3 = vld [vmem:[%s3398_s3 + $0xc] ss:$28 sps:$4 sm:$0xff]   ;;  %v2242_v6 = vld [vmem:[%s3398_s3 + $0x3c] ss:$28 sps:$4 sm:$0xff]  }
   0x2   :  { %v2236_v2 = vld [vmem:[%s3398_s3 + $0x4] ss:$28 sps:$4 sm:$0xff]   ;;  %27 = vperm.xlu0 %2234, %v22_v0   ;;  %1650 = vmatprep.subr.bf16.mxu1 %v2238_v3  ;;  %v2246_v8 = vld [vmem:[%s3398_s3 + $0x38] ss:$28 sps:$4 sm:$0xff]   ;;  %v2252_v13 = vld [vmem:[%s3398_s3 + $0x70] ss:$28 sps:$4 sm:$0xff]  }
   0x3   :  { %v2240_v4 = vld [vmem:[%s3398_s3] ss:$28 sps:$4 sm:$0xff]   ;;  %v2241_v5 = vld [vmem:[%s3398_s3 + $0x8] ss:$28 sps:$4 sm:$0xff]   ;;  %1568 = vmatprep.subr.bf16.mxu0 %v2236_v2  ;;  %v2248_v11 = vld [vmem:[%s3398_s3 + $0x74] ss:$28 sps:$4 sm:$0xff]  }
   0x4   :  { %1569 = vmatpush1.bf16.msra.mxu0 %v2240_v4  ;;  %v2244_v7 = vld [vmem:[%s3398_s3 + $0x44] ss:$28 sps:$4 sm:$0xff]   ;;  %1651 = vmatpush1.bf16.msra.mxu1 %v2241_v5  ;;  %v2250_v12 = vld [vmem:[%s3398_s3 + $0x7c] ss:$28 sps:$4 sm:$0xff]   ;;  %v2254_v15 = vld [vmem:[%s3398_s3 + $0xac] ss:$28 sps:$4 sm:$0xff]   ;;  %v31_v5 = vlaneseq }
   0x5   :  { %1570 = vmatprep.subr.bf16.mxu0 %v2242_v6  ;;  %v2247_v9 = vld [vmem:[%s3398_s3 + $0x40] ss:$28 sps:$4 sm:$0xff]   ;;  %1652 = vmatprep.subr.bf16.mxu1 %v2244_v7  ;;  %v2253_v14 = vld [vmem:[%s3398_s3 + $0x78] ss:$28 sps:$4 sm:$0xff]   ;;  %v2258_v17 = vld [vmem:[%s3398_s3 + $0xa8] ss:$28 sps:$4 sm:$0xff]  }
   0x6   :  { %2235 = vset.pattern.permute.xlu0 %v2595_v10  ;;  %v2256_v16 = vld [vmem:[%s3398_s3 + $0xb4] ss:$28 sps:$4 sm:$0xff]   ;;  %v2260_v19 = vld [vmem:[%s3398_s3 + $0xe4] ss:$28 sps:$4 sm:$0xff]   ;;  %v2262_v20 = vld [vmem:[%s3398_s3 + $0xec] ss:$28 sps:$4 sm:$0xff]  }
   0x7   :  { %83 = vperm.xlu0 %2235, %v22_v0   ;;  %v2259_v18 = vld [vmem:[%s3398_s3 + $0xb0] ss:$28 sps:$4 sm:$0xff]   ;;  %v2264_v21 = vld [vmem:[%s3398_s3 + $0xe0] ss:$28 sps:$4 sm:$0xff]   ;;  %v2265_v22 = vld [vmem:[%s3398_s3 + $0xe8] ss:$28 sps:$4 sm:$0xff]  }
   0x8   :  { %1571 = vmatpush1.bf16.msra.mxu0 %v2246_v8  ;;  %1653 = vmatpush1.bf16.msra.mxu1 %v2247_v9  ;;  %v2266_v23 = vld [vmem:[%s3398_s3 + $0x11c] ss:$28 sps:$4 sm:$0xff]   ;;  %v2268_v24 = vld [vmem:[%s3398_s3 + $0x124] ss:$28 sps:$4 sm:$0xff]   ;;  %v2272_v27 = vld [vmem:[%s3398_s3 + $0x154] ss:$28 sps:$4 sm:$0xff]  }
   0x9   :  { %1572 = vmatprep.subr.bf16.mxu0 %v2248_v11  ;;  %1654 = vmatprep.subr.bf16.mxu1 %v2250_v12  ;;  %v2270_v25 = vld [vmem:[%s3398_s3 + $0x118] ss:$28 sps:$4 sm:$0xff]   ;;  %v2271_v26 = vld [vmem:[%s3398_s3 + $0x120] ss:$28 sps:$4 sm:$0xff]   ;;  %v2276_v29 = vld [vmem:[%s3398_s3 + $0x150] ss:$28 sps:$4 sm:$0xff]  }
   0xa   :  { %v2274_v28 = vld [vmem:[%s3398_s3 + $0x15c] ss:$28 sps:$4 sm:$0xff]   ;;  %v2278_v31 = vld [vmem:[%s3398_s3 + $0x18c] ss:$28 sps:$4 sm:$0xff]   ;;  %v2280_v32 = vld [vmem:[%s3398_s3 + $0x194] ss:$28 sps:$4 sm:$0xff]  }
   0xb   :  { %v2277_v30 = vld [vmem:[%s3398_s3 + $0x158] ss:$28 sps:$4 sm:$0xff]   ;;  %v2282_v33 = vld [vmem:[%s3398_s3 + $0x188] ss:$28 sps:$4 sm:$0xff]   ;;  %v2283_v34 = vld [vmem:[%s3398_s3 + $0x190] ss:$28 sps:$4 sm:$0xff]  }
   0xc   :  { %1573 = vmatpush1.bf16.msra.mxu0 %v2252_v13  ;;  %1655 = vmatpush1.bf16.msra.mxu1 %v2253_v14  ;;  %v2284_v35 = vld [vmem:[%s3398_s3 + $0x1c4] ss:$28 sps:$4 sm:$0xff]   ;;  %v2286_v36 = vld [vmem:[%s3398_s3 + $0x1cc] ss:$28 sps:$4 sm:$0xff]   ;;  %v2290_v39 = vld [vmem:[%s3398_s3 + $0x1fc] ss:$28 sps:$4 sm:$0xff]  }
   0xd   :  { %1574 = vmatprep.subr.bf16.mxu0 %v2254_v15  ;;  %1656 = vmatprep.subr.bf16.mxu1 %v2256_v16  ;;  %v2288_v37 = vld [vmem:[%s3398_s3 + $0x1c0] ss:$28 sps:$4 sm:$0xff]   ;;  %v2289_v38 = vld [vmem:[%s3398_s3 + $0x1c8] ss:$28 sps:$4 sm:$0xff]   ;;  %v2294_v41 = vld [vmem:[%s3398_s3 + $0x1f8] ss:$28 sps:$4 sm:$0xff]  }
   0xe   :  { %v2292_v40 = vld [vmem:[%s3398_s3 + $0x204] ss:$28 sps:$4 sm:$0xff]   ;;  %v2296_v43 = vld [vmem:[%s3398_s3 + $0x234] ss:$28 sps:$4 sm:$0xff]   ;;  %v2298_v44 = vld [vmem:[%s3398_s3 + $0x23c] ss:$28 sps:$4 sm:$0xff]  }
   0xf   :  { %v2295_v42 = vld [vmem:[%s3398_s3 + $0x200] ss:$28 sps:$4 sm:$0xff]   ;;  %v2300_v45 = vld [vmem:[%s3398_s3 + $0x230] ss:$28 sps:$4 sm:$0xff]   ;;  %v2301_v46 = vld [vmem:[%s3398_s3 + $0x238] ss:$28 sps:$4 sm:$0xff]  }
  0x10   :  { %1575 = vmatpush1.bf16.msra.mxu0 %v2258_v17  ;;  %1657 = vmatpush1.bf16.msra.mxu1 %v2259_v18  ;;  %v2302_v47 = vld [vmem:[%s3398_s3 + $0x26c] ss:$28 sps:$4 sm:$0xff]   ;;  %v2304_v48 = vld [vmem:[%s3398_s3 + $0x274] ss:$28 sps:$4 sm:$0xff]   ;;  %v2308_v51 = vld [vmem:[%s3398_s3 + $0x2a4] ss:$28 sps:$4 sm:$0xff]  }
  0x11   :  { %1576 = vmatprep.subr.bf16.mxu0 %v2260_v19  ;;  %1658 = vmatprep.subr.bf16.mxu1 %v2262_v20  ;;  %v2306_v49 = vld [vmem:[%s3398_s3 + $0x268] ss:$28 sps:$4 sm:$0xff]   ;;  %v2307_v50 = vld [vmem:[%s3398_s3 + $0x270] ss:$28 sps:$4 sm:$0xff]   ;;  %v2312_v53 = vld [vmem:[%s3398_s3 + $0x2a0] ss:$28 sps:$4 sm:$0xff]  }
  0x12   :  { %v2310_v52 = vld [vmem:[%s3398_s3 + $0x2ac] ss:$28 sps:$4 sm:$0xff]   ;;  %v2314_v55 = vld [vmem:[%s3398_s3 + $0x2dc] ss:$28 sps:$4 sm:$0xff]   ;;  %v2316_v56 = vld [vmem:[%s3398_s3 + $0x2e4] ss:$28 sps:$4 sm:$0xff]  }
  0x13   :  { %v2313_v54 = vld [vmem:[%s3398_s3 + $0x2a8] ss:$28 sps:$4 sm:$0xff]   ;;  %v2318_v57 = vld [vmem:[%s3398_s3 + $0x2d8] ss:$28 sps:$4 sm:$0xff]   ;;  %v2319_v58 = vld [vmem:[%s3398_s3 + $0x2e0] ss:$28 sps:$4 sm:$0xff]  }
  0x14   :  { %1577 = vmatpush1.bf16.msra.mxu0 %v2264_v21  ;;  %1659 = vmatpush1.bf16.msra.mxu1 %v2265_v22  ;;  %v2320_v59 = vld [vmem:[%s3398_s3 + $0x314] ss:$28 sps:$4 sm:$0xff]   ;;  %v2322_v60 = vld [vmem:[%s3398_s3 + $0x31c] ss:$28 sps:$4 sm:$0xff]   ;;  %v2326_v63 = vld [vmem:[%s3398_s3 + $0x34c] ss:$28 sps:$4 sm:$0xff]  }
  0x15   :  { %1578 = vmatprep.subr.bf16.mxu0 %v2266_v23  ;;  %1660 = vmatprep.subr.bf16.mxu1 %v2268_v24  ;;  %v2324_v61 = vld [vmem:[%s3398_s3 + $0x310] ss:$28 sps:$4 sm:$0xff]   ;;  %v2325_v62 = vld [vmem:[%s3398_s3 + $0x318] ss:$28 sps:$4 sm:$0xff]   ;;  %v2330_v1 = vld [vmem:[%s3398_s3 + $0x348] ss:$28 sps:$4 sm:$0xff]  }
  0x16   :  { %v2328_v0 = vld [vmem:[%s3398_s3 + $0x354] ss:$28 sps:$4 sm:$0xff]   ;;  %v2334_v3 = vld [vmem:[%s3398_s3 + $0x384] ss:$28 sps:$4 sm:$0xff]   ;;  %v2337_v4 = vld [vmem:[%s3398_s3 + $0x38c] ss:$28 sps:$4 sm:$0xff]  }
  0x17   :  { %v2331_v2 = vld [vmem:[%s3398_s3 + $0x350] ss:$28 sps:$4 sm:$0xff]   ;;  %v2828_v6 = vshrl.u32 %v31_v5, 7  ;;  %v24_v11 = vld [vmem:[%s3396_s1] ss:$2 sm:$0xf] }
  0x18   :  { %1579 = vmatpush1.bf16.msra.mxu0 %v2270_v25  ;;  %1661 = vmatpush1.bf16.msra.mxu1 %v2271_v26  ;;  %v23_v12 = vld [vmem:[%s3397_s2] sm:$0xf] }
  0x19   :  { %1580 = vmatprep.subr.bf16.mxu0 %v2272_v27  ;;  %1662 = vmatprep.subr.bf16.mxu1 %v2274_v28  ;;  %v2831_v7 = vsub.s32 0, %v2828_v6  ;;  %v2834_v8 = vsub.s32 1, %v2828_v6  ;;  %v2837_v9 = vsub.s32 2, %v2828_v6  ;;  %v2840_v10 = vsub.s32 3, %v2828_v6 }
  0x1a   :  { %v1944_v17 = vld [vmem:[%s3396_s1 + $0x1] ss:$2 sm:$0xf] }
  0x1b   :  { %v34_v13 = vrot.slane %v24_v11, %v2831_v7  ;;  %v38_v14 = vrot.slane %v24_v11, %v2834_v8  ;;  %v42_v15 = vrot.slane %v24_v11, %v2837_v9  ;;  %v46_v16 = vrot.slane %v24_v11, %v2840_v10 }
  0x1c   :  { %1581 = vmatpush1.bf16.msra.mxu0 %v2276_v29  ;;  %1663 = vmatpush1.bf16.msra.mxu1 %v2277_v30  ;;  %v67_v18 = vrot.slane %v23_v12, %v2837_v9  ;;  %v59_v20 = vrot.slane %v23_v12, %v2831_v7  ;;  %v63_v21 = vrot.slane %v23_v12, %v2834_v8 }
  0x1d   :  { %1582 = vmatprep.subr.bf16.mxu0 %v2278_v31  ;;  %1664 = vmatprep.subr.bf16.mxu1 %v2280_v32  ;;  %v71_v22 = vrot.slane %v23_v12, %v2840_v10  ;;  %v90_v27 = vrot.slane %v1944_v17, %v2831_v7  ;;  %v94_v28 = vrot.slane %v1944_v17, %v2834_v8 }
  0x1e   :  { %v98_v29 = vrot.slane %v1944_v17, %v2837_v9  ;;  %v102_v30 = vrot.slane %v1944_v17, %v2840_v10 }
  0x20   :  { %1583 = vmatpush1.bf16.msra.mxu0 %v2282_v33  ;;  %1665 = vmatpush1.bf16.msra.mxu1 %v2283_v34 }
  0x21   :  { %1584 = vmatprep.subr.bf16.mxu0 %v2284_v35  ;;  %1666 = vmatprep.subr.bf16.mxu1 %v2286_v36 }
  0x24   :  { %1585 = vmatpush1.bf16.msra.mxu0 %v2288_v37  ;;  %1667 = vmatpush1.bf16.msra.mxu1 %v2289_v38 }
  0x25   :  { %1586 = vmatprep.subr.bf16.mxu0 %v2290_v39  ;;  %1668 = vmatprep.subr.bf16.mxu1 %v2292_v40 }
  0x28   :  { %1587 = vmatpush1.bf16.msra.mxu0 %v2294_v41  ;;  %1669 = vmatpush1.bf16.msra.mxu1 %v2295_v42 }
  0x29   :  { %1588 = vmatprep.subr.bf16.mxu0 %v2296_v43  ;;  %1670 = vmatprep.subr.bf16.mxu1 %v2298_v44 }
  0x2c   :  { %1589 = vmatpush1.bf16.msra.mxu0 %v2300_v45  ;;  %1671 = vmatpush1.bf16.msra.mxu1 %v2301_v46  ;;  %v2332_v46 = vld [vmem:[%s3398_s3 + $0x380] ss:$28 sps:$4 sm:$0xff]  }
  0x2d   :  { %1590 = vmatprep.subr.bf16.mxu0 %v2302_v47  ;;  %1672 = vmatprep.subr.bf16.mxu1 %v2304_v48  ;;  %v2335_v48 = vld [vmem:[%s3398_s3 + $0x388] ss:$28 sps:$4 sm:$0xff]  }
  0x30   :  { %1591 = vmatpush1.bf16.msra.mxu0 %v2306_v49  ;;  %1673 = vmatpush1.bf16.msra.mxu1 %v2307_v50 }
  0x31   :  { %1592 = vmatprep.subr.bf16.mxu0 %v2308_v51  ;;  %1674 = vmatprep.subr.bf16.mxu1 %v2310_v52  ;;  %v2340_v51 = vld [vmem:[%s3398_s3 + $0x3bc] ss:$28 sps:$4 sm:$0xff]  }
  0x32   :  { %v2338_v52 = vld [vmem:[%s3398_s3 + $0x3b8] ss:$28 sps:$4 sm:$0xff]  }
  0x34   :  { %1593 = vmatpush1.bf16.msra.mxu0 %v2312_v53  ;;  %1675 = vmatpush1.bf16.msra.mxu1 %v2313_v54  ;;  %v2343_v53 = vld [vmem:[%s3398_s3 + $0x3c4] ss:$28 sps:$4 sm:$0xff]  }
  0x35   :  { %1594 = vmatprep.subr.bf16.mxu0 %v2314_v55  ;;  %1676 = vmatprep.subr.bf16.mxu1 %v2316_v56  ;;  %v2341_v55 = vld [vmem:[%s3398_s3 + $0x3c0] ss:$28 sps:$4 sm:$0xff]   ;;  %v2346_v56 = vld [vmem:[%s3398_s3 + $0x3f4] ss:$28 sps:$4 sm:$0xff]  }
  0x38   :  { %1595 = vmatpush1.bf16.msra.mxu0 %v2318_v57  ;;  %1677 = vmatpush1.bf16.msra.mxu1 %v2319_v58  ;;  %v2349_v57 = vld [vmem:[%s3398_s3 + $0x3fc] ss:$28 sps:$4 sm:$0xff]   ;;  %v2344_v58 = vld [vmem:[%s3398_s3 + $0x3f0] ss:$28 sps:$4 sm:$0xff]  }
  0x39   :  { %1596 = vmatprep.subr.bf16.mxu0 %v2320_v59  ;;  %1678 = vmatprep.subr.bf16.mxu1 %v2322_v60  ;;  %v2347_v59 = vld [vmem:[%s3398_s3 + $0x3f8] ss:$28 sps:$4 sm:$0xff]   ;;  %v2352_v60 = vld [vmem:[%s3398_s3 + $0x42c] ss:$28 sps:$4 sm:$0xff]  }
  0x3c   :  { %1597 = vmatpush1.bf16.msra.mxu0 %v2324_v61  ;;  %1679 = vmatpush1.bf16.msra.mxu1 %v2325_v62  ;;  %v2355_v61 = vld [vmem:[%s3398_s3 + $0x434] ss:$28 sps:$4 sm:$0xff]   ;;  %v2350_v62 = vld [vmem:[%s3398_s3 + $0x428] ss:$28 sps:$4 sm:$0xff]  }
  0x3d   :  { %1598 = vmatprep.subr.bf16.mxu0 %v2326_v63  ;;  %1680 = vmatprep.subr.bf16.mxu1 %v2328_v0  ;;  %v2353_v63 = vld [vmem:[%s3398_s3 + $0x430] ss:$28 sps:$4 sm:$0xff]   ;;  %v2358_v0 = vld [vmem:[%s3398_s3 + $0x464] ss:$28 sps:$4 sm:$0xff]  }
  0x40   :  { %1599 = vmatpush1.bf16.msra.mxu0 %v2330_v1  ;;  %1681 = vmatpush1.bf16.msra.mxu1 %v2331_v2  ;;  %v2361_v1 = vld [vmem:[%s3398_s3 + $0x46c] ss:$28 sps:$4 sm:$0xff]  }
  0x41   :  { %1609 = vmatprep.subr.bf16.mxu0 %v2334_v3  ;;  %1691 = vmatprep.subr.bf16.mxu1 %v2337_v4 }
  0x81   :  { %v28_v19 = vpop.permute.xlu0 %27 }
  0x82   :  { %v51_v23 = vmul.f32 %v34_v13, %v28_v19  ;;  %v52_v24 = vmul.f32 %v38_v14, %v28_v19  ;;  %v53_v25 = vmul.f32 %v42_v15, %v28_v19  ;;  %v54_v26 = vmul.f32 %v46_v16, %v28_v19 }
  0x84   :  { %v78_v31 = vadd.f32 %v67_v18, %v53_v25  ;;  %v76_v32 = vadd.f32 %v59_v20, %v51_v23  ;;  %v77_v33 = vadd.f32 %v63_v21, %v52_v24  ;;  %v79_v34 = vadd.f32 %v71_v22, %v54_v26 }
  0x86   :  { %v84_v35 = vpop.permute.xlu0 %83 }
  0x87   :  { %v107_v36 = vmul.f32 %v90_v27, %v84_v35  ;;  %v108_v37 = vmul.f32 %v94_v28, %v84_v35  ;;  %v109_v38 = vmul.f32 %v98_v29, %v84_v35  ;;  %v110_v39 = vmul.f32 %v102_v30, %v84_v35 }
  0x89   :  { %v111_v40 = vadd.f32 %v107_v36, %v76_v32  ;;  %v112_v41 = vadd.f32 %v108_v37, %v77_v33  ;;  %v2863_v42 = vadd.f32 %v109_v38, %v78_v31  ;;  %v114_v43 = vadd.f32 %v110_v39, %v79_v34 }
  0x8b   :  { %v115_v44 = vmax.f32 %v111_v40, 0.0  ;;  %v116_v45 = vmax.f32 %v112_v41, 0.0  ;;  %v118_v47 = vmax.f32 %v114_v43, 0.0 }
  0x8d   :  { %v2871_v49 = vpack.c.bf16 %v115_v44, %v115_v44  ;;  %v2873_v50 = vpack.c.bf16 %v116_v45, %v116_v45  ;;  %v2886_v54 = vpack.c.bf16 %v118_v47, %v118_v47 }
  0x8f   :  { %1600 = vmatprep.mubr.bf16.mxu0 %v2873_v50  ;;  %1682 = vmatprep.mubr.bf16.mxu1 %v2873_v50 }
  0x90   :  { %1601 = vmatmul.mubr.bf16.vlgmr.msra.gmra.mrb[0].mxu0 %v2871_v49  ;;  %1683 = vmatmul.mubr.bf16.vlgmr.msra.gmra.mrb[0].mxu1 %v2871_v49 }
  0x91   :  { %1610 = vmatpush1.bf16.msra.mxu0 %v2332_v46  ;;  %1692 = vmatpush1.bf16.msra.mxu1 %v2335_v48 }
  0x92   :  { %1641 = vmatprep.mubr.bf16.mxu0 %v2886_v54  ;;  %1723 = vmatprep.mubr.bf16.mxu1 %v2886_v54 }
  0x93   :  { %1611 = vmatprep.subr.bf16.mxu0 %v2340_v51  ;;  %1693 = vmatprep.subr.bf16.mxu1 %v2343_v53 }
  0x95   :  { %1612 = vmatpush1.bf16.msra.mxu0 %v2338_v52  ;;  %1694 = vmatpush1.bf16.msra.mxu1 %v2341_v55 }
  0x96   :  { %1613 = vmatprep.subr.bf16.mxu0 %v2346_v56  ;;  %1695 = vmatprep.subr.bf16.mxu1 %v2349_v57 }
  0x99   :  { %1614 = vmatpush1.bf16.msra.mxu0 %v2344_v58  ;;  %1696 = vmatpush1.bf16.msra.mxu1 %v2347_v59 }
  0x9a   :  { %1615 = vmatprep.subr.bf16.mxu0 %v2352_v60  ;;  %1697 = vmatprep.subr.bf16.mxu1 %v2355_v61 }
  0x9b   :  { %10 = vsyncpa [#allocation3], 0  ;;  %v2356_v2 = vld [vmem:[%s3398_s3 + $0x460] ss:$28 sps:$4 sm:$0xff]   ;;  %v2359_v3 = vld [vmem:[%s3398_s3 + $0x468] ss:$28 sps:$4 sm:$0xff]  }
  0x9c   :  { %v2364_v4 = vld [vmem:[%s3398_s3 + $0x49c] ss:$28 sps:$4 sm:$0xff]   ;;  %v2367_v5 = vld [vmem:[%s3398_s3 + $0x4a4] ss:$28 sps:$4 sm:$0xff]   ;;  %v2370_v13 = vld [vmem:[%s3398_s3 + $0x4d4] ss:$28 sps:$4 sm:$0xff]  }
  0x9d   :  { %1616 = vmatpush1.bf16.msra.mxu0 %v2350_v62  ;;  %1698 = vmatpush1.bf16.msra.mxu1 %v2353_v63  ;;  %v2362_v11 = vld [vmem:[%s3398_s3 + $0x498] ss:$28 sps:$4 sm:$0xff]   ;;  %v2365_v12 = vld [vmem:[%s3398_s3 + $0x4a0] ss:$28 sps:$4 sm:$0xff]   ;;  %v2368_v15 = vld [vmem:[%s3398_s3 + $0x4d0] ss:$28 sps:$4 sm:$0xff]  }
  0x9e   :  { %1617 = vmatprep.subr.bf16.mxu0 %v2358_v0  ;;  %1699 = vmatprep.subr.bf16.mxu1 %v2361_v1  ;;  %v2373_v14 = vld [vmem:[%s3398_s3 + $0x4dc] ss:$28 sps:$4 sm:$0xff]   ;;  %v2376_v17 = vld [vmem:[%s3398_s3 + $0x50c] ss:$28 sps:$4 sm:$0xff]   ;;  %v2379_v18 = vld [vmem:[%s3398_s3 + $0x514] ss:$28 sps:$4 sm:$0xff]  }
  0x9f   :  { %v2371_v16 = vld [vmem:[%s3398_s3 + $0x4d8] ss:$28 sps:$4 sm:$0xff]   ;;  %v2374_v19 = vld [vmem:[%s3398_s3 + $0x508] ss:$28 sps:$4 sm:$0xff]   ;;  %v2377_v20 = vld [vmem:[%s3398_s3 + $0x510] ss:$28 sps:$4 sm:$0xff]  }
  0xa0   :  { %v2382_v21 = vld [vmem:[%s3398_s3 + $0x544] ss:$28 sps:$4 sm:$0xff]   ;;  %v2385_v22 = vld [vmem:[%s3398_s3 + $0x54c] ss:$28 sps:$4 sm:$0xff]   ;;  %v2388_v25 = vld [vmem:[%s3398_s3 + $0x57c] ss:$28 sps:$4 sm:$0xff]  }
  0xa1   :  { %1618 = vmatpush1.bf16.msra.mxu0 %v2356_v2  ;;  %1700 = vmatpush1.bf16.msra.mxu1 %v2359_v3  ;;  %v2380_v23 = vld [vmem:[%s3398_s3 + $0x540] ss:$28 sps:$4 sm:$0xff]   ;;  %v2383_v24 = vld [vmem:[%s3398_s3 + $0x548] ss:$28 sps:$4 sm:$0xff]   ;;  %v2386_v27 = vld [vmem:[%s3398_s3 + $0x578] ss:$28 sps:$4 sm:$0xff]  }
  0xa2   :  { %1619 = vmatprep.subr.bf16.mxu0 %v2364_v4  ;;  %1701 = vmatprep.subr.bf16.mxu1 %v2367_v5  ;;  %v2391_v26 = vld [vmem:[%s3398_s3 + $0x584] ss:$28 sps:$4 sm:$0xff]   ;;  %v2394_v29 = vld [vmem:[%s3398_s3 + $0x5b4] ss:$28 sps:$4 sm:$0xff]   ;;  %v2397_v30 = vld [vmem:[%s3398_s3 + $0x5bc] ss:$28 sps:$4 sm:$0xff]  }
  0xa3   :  { %v2389_v28 = vld [vmem:[%s3398_s3 + $0x580] ss:$28 sps:$4 sm:$0xff]   ;;  %v2392_v31 = vld [vmem:[%s3398_s3 + $0x5b0] ss:$28 sps:$4 sm:$0xff]   ;;  %v2395_v32 = vld [vmem:[%s3398_s3 + $0x5b8] ss:$28 sps:$4 sm:$0xff]  }
  0xa4   :  { %v2400_v33 = vld [vmem:[%s3398_s3 + $0x5ec] ss:$28 sps:$4 sm:$0xff]   ;;  %v2403_v34 = vld [vmem:[%s3398_s3 + $0x5f4] ss:$28 sps:$4 sm:$0xff]   ;;  %v2406_v37 = vld [vmem:[%s3398_s3 + $0x624] ss:$28 sps:$4 sm:$0xff]  }
  0xa5   :  { %1620 = vmatpush1.bf16.msra.mxu0 %v2362_v11  ;;  %1702 = vmatpush1.bf16.msra.mxu1 %v2365_v12  ;;  %v2398_v35 = vld [vmem:[%s3398_s3 + $0x5e8] ss:$28 sps:$4 sm:$0xff]   ;;  %v2401_v36 = vld [vmem:[%s3398_s3 + $0x5f0] ss:$28 sps:$4 sm:$0xff]   ;;  %v2404_v39 = vld [vmem:[%s3398_s3 + $0x620] ss:$28 sps:$4 sm:$0xff]  }
  0xa6   :  { %1621 = vmatprep.subr.bf16.mxu0 %v2370_v13  ;;  %1703 = vmatprep.subr.bf16.mxu1 %v2373_v14  ;;  %v2409_v38 = vld [vmem:[%s3398_s3 + $0x62c] ss:$28 sps:$4 sm:$0xff]   ;;  %v2412_v41 = vld [vmem:[%s3398_s3 + $0x65c] ss:$28 sps:$4 sm:$0xff]   ;;  %v2415_v43 = vld [vmem:[%s3398_s3 + $0x664] ss:$28 sps:$4 sm:$0xff]  }
  0xa7   :  { %v2407_v40 = vld [vmem:[%s3398_s3 + $0x628] ss:$28 sps:$4 sm:$0xff]   ;;  %v2410_v44 = vld [vmem:[%s3398_s3 + $0x658] ss:$28 sps:$4 sm:$0xff]   ;;  %v2413_v45 = vld [vmem:[%s3398_s3 + $0x660] ss:$28 sps:$4 sm:$0xff]  }
  0xa8   :  { %v2418_v46 = vld [vmem:[%s3398_s3 + $0x694] ss:$28 sps:$4 sm:$0xff]   ;;  %v2421_v47 = vld [vmem:[%s3398_s3 + $0x69c] ss:$28 sps:$4 sm:$0xff]   ;;  %v2424_v52 = vld [vmem:[%s3398_s3 + $0x6cc] ss:$28 sps:$4 sm:$0xff]  }
  0xa9   :  { %1622 = vmatpush1.bf16.msra.mxu0 %v2368_v15  ;;  %1704 = vmatpush1.bf16.msra.mxu1 %v2371_v16  ;;  %v2416_v48 = vld [vmem:[%s3398_s3 + $0x690] ss:$28 sps:$4 sm:$0xff]   ;;  %v2419_v51 = vld [vmem:[%s3398_s3 + $0x698] ss:$28 sps:$4 sm:$0xff]   ;;  %v2422_v55 = vld [vmem:[%s3398_s3 + $0x6c8] ss:$28 sps:$4 sm:$0xff]  }
  0xaa   :  { %1623 = vmatprep.subr.bf16.mxu0 %v2376_v17  ;;  %1705 = vmatprep.subr.bf16.mxu1 %v2379_v18  ;;  %v2427_v53 = vld [vmem:[%s3398_s3 + $0x6d4] ss:$28 sps:$4 sm:$0xff]   ;;  %v117_v57 = vmax.f32 %v2863_v42, 0.0  ;;  %v2435_v62 = vld [vmem:[%s3398_s3 + $0x4c] ss:$28 sps:$4 sm:$0xff]   ;;  %vm1928_vm0 = vcmask 130048  }
  0xab   :  { %v2425_v56 = vld [vmem:[%s3398_s3 + $0x6d0] ss:$28 sps:$4 sm:$0xff]   ;;  %v2431_v59 = vld [vmem:[%s3398_s3 + $0x1d8] ss:$28 sps:$4 sm:$0xff]   ;;  %v2433_v0 = vld [vmem:[%s3398_s3 + $0x48] ss:$28 sps:$4 sm:$0xff]  }
  0xac   :  { %v2430_v58 = vld [vmem:[%s3398_s3 + $0x14] ss:$28 sps:$4 sm:$0xff]   ;;  %v3073_v61 = vpack.c.bf16 %v117_v57, %v117_v57  ;;  %v2440_v2 = vld [vmem:[%s3398_s3 + $0x84] ss:$28 sps:$4 sm:$0xff]   ;;  %v2445_v5 = vld [vmem:[%s3398_s3 + $0xbc] ss:$28 sps:$4 sm:$0xff]  }
  0xad   :  { %1624 = vmatpush1.bf16.msra.mxu0 %v2374_v19  ;;  %1706 = vmatpush1.bf16.msra.mxu1 %v2377_v20  ;;  %v2428_v60 = vld [vmem:[%s3398_s3 + $0x10] ss:$28 sps:$4 sm:$0xff]   ;;  %v2432_v42 = vld [vmem:[%s3398_s3 + $0x18] ss:$28 sps:$4 sm:$0xff]   ;;  %v2441_v3 = vld [vmem:[%s3398_s3 + $0x248] ss:$28 sps:$4 sm:$0xff]  }
  0xae   :  { %1625 = vmatprep.subr.bf16.mxu0 %v2382_v21  ;;  %1707 = vmatprep.subr.bf16.mxu1 %v2385_v22  ;;  %v2436_v63 = vld [vmem:[%s3398_s3 + $0x210] ss:$28 sps:$4 sm:$0xff]   ;;  %v2438_v4 = vld [vmem:[%s3398_s3 + $0x80] ss:$28 sps:$4 sm:$0xff]   ;;  %v2443_v12 = vld [vmem:[%s3398_s3 + $0xb8] ss:$28 sps:$4 sm:$0xff]  }
  0xaf   :  { %v2437_v1 = vld [vmem:[%s3398_s3 + $0x50] ss:$28 sps:$4 sm:$0xff]   ;;  %v2446_v11 = vld [vmem:[%s3398_s3 + $0x280] ss:$28 sps:$4 sm:$0xff]   ;;  %v2451_v15 = vld [vmem:[%s3398_s3 + $0x2b8] ss:$28 sps:$4 sm:$0xff]  }
  0xb0   :  { %v2447_v13 = vld [vmem:[%s3398_s3 + $0xc0] ss:$28 sps:$4 sm:$0xff]   ;;  %v2450_v14 = vld [vmem:[%s3398_s3 + $0xf4] ss:$28 sps:$4 sm:$0xff]   ;;  %v2455_v18 = vld [vmem:[%s3398_s3 + $0x12c] ss:$28 sps:$4 sm:$0xff]  }
  0xb1   :  { %1626 = vmatpush1.bf16.msra.mxu0 %v2380_v23  ;;  %1708 = vmatpush1.bf16.msra.mxu1 %v2383_v24  ;;  %v2448_v16 = vld [vmem:[%s3398_s3 + $0xf0] ss:$28 sps:$4 sm:$0xff]   ;;  %v2452_v17 = vld [vmem:[%s3398_s3 + $0xf8] ss:$28 sps:$4 sm:$0xff]   ;;  %v2453_v20 = vld [vmem:[%s3398_s3 + $0x128] ss:$28 sps:$4 sm:$0xff]  }
  0xb2   :  { %1627 = vmatprep.subr.bf16.mxu0 %v2388_v25  ;;  %1709 = vmatprep.subr.bf16.mxu1 %v2391_v26  ;;  %v2456_v19 = vld [vmem:[%s3398_s3 + $0x2f0] ss:$28 sps:$4 sm:$0xff]   ;;  %v2460_v22 = vld [vmem:[%s3398_s3 + $0x164] ss:$28 sps:$4 sm:$0xff]   ;;  %v2465_v26 = vld [vmem:[%s3398_s3 + $0x19c] ss:$28 sps:$4 sm:$0xff]  }
  0xb3   :  { %v2457_v21 = vld [vmem:[%s3398_s3 + $0x130] ss:$28 sps:$4 sm:$0xff]   ;;  %v2461_v23 = vld [vmem:[%s3398_s3 + $0x328] ss:$28 sps:$4 sm:$0xff]   ;;  %v2458_v24 = vld [vmem:[%s3398_s3 + $0x160] ss:$28 sps:$4 sm:$0xff]  }
  0xb4   :  { %v2462_v25 = vld [vmem:[%s3398_s3 + $0x168] ss:$28 sps:$4 sm:$0xff]   ;;  %v2497_v57 = vld [vmem:[%s3398_s3 + $0x4b0] ss:$28 sps:$4 sm:$0xff]  }
  0xb5   :  { %1628 = vmatpush1.bf16.msra.mxu0 %v2386_v27  ;;  %1710 = vmatpush1.bf16.msra.mxu1 %v2389_v28  ;;  %v2466_v27 = vld [vmem:[%s3398_s3 + $0x360] ss:$28 sps:$4 sm:$0xff]   ;;  %v2463_v28 = vld [vmem:[%s3398_s3 + $0x198] ss:$28 sps:$4 sm:$0xff]  }
  0xb6   :  { %1629 = vmatprep.subr.bf16.mxu0 %v2394_v29  ;;  %1711 = vmatprep.subr.bf16.mxu1 %v2397_v30  ;;  %v2467_v29 = vld [vmem:[%s3398_s3 + $0x1a0] ss:$28 sps:$4 sm:$0xff]   ;;  %v2470_v30 = vld [vmem:[%s3398_s3 + $0x1d4] ss:$28 sps:$4 sm:$0xff]  }
  0xb9   :  { %1630 = vmatpush1.bf16.msra.mxu0 %v2392_v31  ;;  %1712 = vmatpush1.bf16.msra.mxu1 %v2395_v32  ;;  %v2471_v31 = vld [vmem:[%s3398_s3 + $0x558] ss:$28 sps:$4 sm:$0xff]   ;;  %v2468_v32 = vld [vmem:[%s3398_s3 + $0x1d0] ss:$28 sps:$4 sm:$0xff]  }
  0xba   :  { %1631 = vmatprep.subr.bf16.mxu0 %v2400_v33  ;;  %1713 = vmatprep.subr.bf16.mxu1 %v2403_v34  ;;  %v2472_v33 = vld [vmem:[%s3398_s3 + $0x398] ss:$28 sps:$4 sm:$0xff]   ;;  %v2475_v34 = vld [vmem:[%s3398_s3 + $0x20c] ss:$28 sps:$4 sm:$0xff]  }
  0xbd   :  { %1632 = vmatpush1.bf16.msra.mxu0 %v2398_v35  ;;  %1714 = vmatpush1.bf16.msra.mxu1 %v2401_v36  ;;  %v2476_v35 = vld [vmem:[%s3398_s3 + $0x590] ss:$28 sps:$4 sm:$0xff]   ;;  %v2473_v36 = vld [vmem:[%s3398_s3 + $0x208] ss:$28 sps:$4 sm:$0xff]  }
  0xbe   :  { %1633 = vmatprep.subr.bf16.mxu0 %v2406_v37  ;;  %1715 = vmatprep.subr.bf16.mxu1 %v2409_v38  ;;  %v2477_v37 = vld [vmem:[%s3398_s3 + $0x3d0] ss:$28 sps:$4 sm:$0xff]   ;;  %v2480_v38 = vld [vmem:[%s3398_s3 + $0x244] ss:$28 sps:$4 sm:$0xff]  }
  0xc1   :  { %1634 = vmatpush1.bf16.msra.mxu0 %v2404_v39  ;;  %1716 = vmatpush1.bf16.msra.mxu1 %v2407_v40  ;;  %v2481_v39 = vld [vmem:[%s3398_s3 + $0x5c8] ss:$28 sps:$4 sm:$0xff]   ;;  %v2478_v40 = vld [vmem:[%s3398_s3 + $0x240] ss:$28 sps:$4 sm:$0xff]  }
  0xc2   :  { %1635 = vmatprep.subr.bf16.mxu0 %v2412_v41  ;;  %1717 = vmatprep.subr.bf16.mxu1 %v2415_v43  ;;  %v2482_v41 = vld [vmem:[%s3398_s3 + $0x408] ss:$28 sps:$4 sm:$0xff]   ;;  %v2485_v43 = vld [vmem:[%s3398_s3 + $0x27c] ss:$28 sps:$4 sm:$0xff]  }
  0xc5   :  { %1636 = vmatpush1.bf16.msra.mxu0 %v2410_v44  ;;  %1718 = vmatpush1.bf16.msra.mxu1 %v2413_v45  ;;  %v2486_v44 = vld [vmem:[%s3398_s3 + $0x600] ss:$28 sps:$4 sm:$0xff]   ;;  %v2483_v45 = vld [vmem:[%s3398_s3 + $0x278] ss:$28 sps:$4 sm:$0xff]  }
  0xc6   :  { %1637 = vmatprep.subr.bf16.mxu0 %v2418_v46  ;;  %1719 = vmatprep.subr.bf16.mxu1 %v2421_v47  ;;  %v2487_v46 = vld [vmem:[%s3398_s3 + $0x440] ss:$28 sps:$4 sm:$0xff]   ;;  %v2490_v47 = vld [vmem:[%s3398_s3 + $0x2b4] ss:$28 sps:$4 sm:$0xff]  }
  0xc9   :  { %1638 = vmatpush1.bf16.msra.mxu0 %v2416_v48  ;;  %1720 = vmatpush1.bf16.msra.mxu1 %v2419_v51  ;;  %v2491_v48 = vld [vmem:[%s3398_s3 + $0x638] ss:$28 sps:$4 sm:$0xff]   ;;  %v2488_v51 = vld [vmem:[%s3398_s3 + $0x2b0] ss:$28 sps:$4 sm:$0xff]  }
  0xca   :  { %1639 = vmatprep.subr.bf16.mxu0 %v2424_v52  ;;  %1721 = vmatprep.subr.bf16.mxu1 %v2427_v53  ;;  %v2492_v52 = vld [vmem:[%s3398_s3 + $0x478] ss:$28 sps:$4 sm:$0xff]   ;;  %v2495_v53 = vld [vmem:[%s3398_s3 + $0x2ec] ss:$28 sps:$4 sm:$0xff]  }
  0xcd   :  { %1640 = vmatpush1.bf16.msra.mxu0 %v2422_v55  ;;  %1722 = vmatpush1.bf16.msra.mxu1 %v2425_v56  ;;  %v2496_v55 = vld [vmem:[%s3398_s3 + $0x670] ss:$28 sps:$4 sm:$0xff]   ;;  %v2493_v56 = vld [vmem:[%s3398_s3 + $0x2e8] ss:$28 sps:$4 sm:$0xff]  }
  0xce   :  { %1732 = vmatprep.subr.bf16.mxu0 %v2430_v58  ;;  %2169 = vmatprep.subr.bf16.mxu1 %v2431_v59  ;;  %v2500_v58 = vld [vmem:[%s3398_s3 + $0x324] ss:$28 sps:$4 sm:$0xff]  }
  0xcf   :  { %v2501_v59 = vld [vmem:[%s3398_s3 + $0x6a8] ss:$28 sps:$4 sm:$0xff]  }
  0xd0   :  { %1642 = vmatmul.mubr.bf16.vlgmr.msra.gmra.mrb[0].mxu0 %v3073_v61  ;;  %1724 = vmatmul.mubr.bf16.vlgmr.msra.gmra.mrb[0].mxu1 %v3073_v61 }
  0xd1   :  { %1733 = vmatpush1.bf16.msra.mxu0 %v2428_v60  ;;  %1764 = vmatprep.mubr.bf16.mxu0 %v2873_v50  ;;  %v2498_v60 = vld [vmem:[%s3398_s3 + $0x320] ss:$28 sps:$4 sm:$0xff]  }
  0xd2   :  { %2170 = vmatpush3.bf16.msra.mxu1 %v2432_v42  ;;  %1846 = vmatprep.mubr.bf16.mxu1 %v2873_v50  ;;  %v2442_v50 = vld [vmem:[%s3398_s3 + $0x88] ss:$28 sps:$4 sm:$0xff]  }
  0xd3   :  { %1734 = vmatprep.subr.bf16.mxu0 %v2435_v62  ;;  %2171 = vmatprep.subr.bf16.mxu1 %v2436_v63  ;;  %v2502_v42 = vld [vmem:[%s3398_s3 + $0x4e8] ss:$28 sps:$4 sm:$0xff]   ;;  %v2505_v62 = vld [vmem:[%s3398_s3 + $0x35c] ss:$28 sps:$4 sm:$0xff]  }
  0xd4   :  { %v2506_v63 = vld [vmem:[%s3398_s3 + $0x6e0] ss:$28 sps:$4 sm:$0xff]  }
  0xd5   :  { %1735 = vmatpush1.bf16.msra.mxu0 %v2433_v0  ;;  %v2503_v0 = vld [vmem:[%s3398_s3 + $0x358] ss:$28 sps:$4 sm:$0xff]  }
  0xd6   :  { %2172 = vmatpush3.bf16.msra.mxu1 %v2437_v1  ;;  %1736 = vmatprep.subr.bf16.mxu0 %v2440_v2  ;;  %v2507_v1 = vld [vmem:[%s3398_s3 + $0x520] ss:$28 sps:$4 sm:$0xff]   ;;  %v2510_v2 = vld [vmem:[%s3398_s3 + $0x394] ss:$28 sps:$4 sm:$0xff]  }
  0xd7   :  { %2173 = vmatprep.subr.bf16.mxu1 %v2441_v3  ;;  %v2508_v3 = vld [vmem:[%s3398_s3 + $0x390] ss:$28 sps:$4 sm:$0xff]  }
  0xd9   :  { %1737 = vmatpush1.bf16.msra.mxu0 %v2438_v4  ;;  %v2513_v4 = vld [vmem:[%s3398_s3 + $0x3cc] ss:$28 sps:$4 sm:$0xff]  }
  0xda   :  { %2174 = vmatpush3.bf16.msra.mxu1 %v2442_v50  ;;  %1738 = vmatprep.subr.bf16.mxu0 %v2445_v5  ;;  %v2511_v50 = vld [vmem:[%s3398_s3 + $0x3c8] ss:$28 sps:$4 sm:$0xff]  }
  0xdb   :  { %2175 = vmatprep.subr.bf16.mxu1 %v2446_v11  ;;  %v2516_v5 = vld [vmem:[%s3398_s3 + $0x404] ss:$28 sps:$4 sm:$0xff]  }
  0xdc   :  { %v2514_v11 = vld [vmem:[%s3398_s3 + $0x400] ss:$28 sps:$4 sm:$0xff]  }
  0xdd   :  { %1739 = vmatpush1.bf16.msra.mxu0 %v2443_v12  ;;  %v2522_v12 = vld [vmem:[%s3398_s3 + $0x474] ss:$28 sps:$4 sm:$0xff]  }
  0xde   :  { %2176 = vmatpush3.bf16.msra.mxu1 %v2447_v13  ;;  %1740 = vmatprep.subr.bf16.mxu0 %v2450_v14  ;;  %v2520_v13 = vld [vmem:[%s3398_s3 + $0x470] ss:$28 sps:$4 sm:$0xff]  }
  0xdf   :  { %2177 = vmatprep.subr.bf16.mxu1 %v2451_v15  ;;  %v2525_v14 = vld [vmem:[%s3398_s3 + $0x4ac] ss:$28 sps:$4 sm:$0xff]  }
  0xe0   :  { %v2523_v15 = vld [vmem:[%s3398_s3 + $0x4a8] ss:$28 sps:$4 sm:$0xff]  }
  0xe1   :  { %1741 = vmatpush1.bf16.msra.mxu0 %v2448_v16  ;;  %v2528_v16 = vld [vmem:[%s3398_s3 + $0x4e4] ss:$28 sps:$4 sm:$0xff]  }
  0xe2   :  { %2178 = vmatpush3.bf16.msra.mxu1 %v2452_v17  ;;  %1742 = vmatprep.subr.bf16.mxu0 %v2455_v18  ;;  %v2526_v17 = vld [vmem:[%s3398_s3 + $0x4e0] ss:$28 sps:$4 sm:$0xff]  }
  0xe3   :  { %2179 = vmatprep.subr.bf16.mxu1 %v2456_v19  ;;  %v2531_v18 = vld [vmem:[%s3398_s3 + $0x51c] ss:$28 sps:$4 sm:$0xff]  }
  0xe4   :  { %v2529_v19 = vld [vmem:[%s3398_s3 + $0x518] ss:$28 sps:$4 sm:$0xff]  }
  0xe5   :  { %1743 = vmatpush1.bf16.msra.mxu0 %v2453_v20  ;;  %v2534_v20 = vld [vmem:[%s3398_s3 + $0x554] ss:$28 sps:$4 sm:$0xff]  }
  0xe6   :  { %2180 = vmatpush3.bf16.msra.mxu1 %v2457_v21  ;;  %1744 = vmatprep.subr.bf16.mxu0 %v2460_v22  ;;  %v2532_v21 = vld [vmem:[%s3398_s3 + $0x550] ss:$28 sps:$4 sm:$0xff]  }
  0xe7   :  { %2181 = vmatprep.subr.bf16.mxu1 %v2461_v23  ;;  %v2537_v22 = vld [vmem:[%s3398_s3 + $0x58c] ss:$28 sps:$4 sm:$0xff]  }
  0xe8   :  { %v2535_v23 = vld [vmem:[%s3398_s3 + $0x588] ss:$28 sps:$4 sm:$0xff]  }
  0xe9   :  { %1745 = vmatpush1.bf16.msra.mxu0 %v2458_v24  ;;  %v2540_v24 = vld [vmem:[%s3398_s3 + $0x5c4] ss:$28 sps:$4 sm:$0xff]  }
  0xea   :  { %2182 = vmatpush3.bf16.msra.mxu1 %v2462_v25  ;;  %1746 = vmatprep.subr.bf16.mxu0 %v2465_v26  ;;  %v2538_v25 = vld [vmem:[%s3398_s3 + $0x5c0] ss:$28 sps:$4 sm:$0xff]  }
  0xeb   :  { %2183 = vmatprep.subr.bf16.mxu1 %v2466_v27  ;;  %v2543_v26 = vld [vmem:[%s3398_s3 + $0x5fc] ss:$28 sps:$4 sm:$0xff]  }
  0xec   :  { %v2541_v27 = vld [vmem:[%s3398_s3 + $0x5f8] ss:$28 sps:$4 sm:$0xff]  }
  0xed   :  { %1747 = vmatpush1.bf16.msra.mxu0 %v2463_v28  ;;  %v2546_v28 = vld [vmem:[%s3398_s3 + $0x634] ss:$28 sps:$4 sm:$0xff]  }
  0xee   :  { %2184 = vmatpush3.bf16.msra.mxu1 %v2467_v29  ;;  %1748 = vmatprep.subr.bf16.mxu0 %v2470_v30  ;;  %v2544_v29 = vld [vmem:[%s3398_s3 + $0x630] ss:$28 sps:$4 sm:$0xff]  }
  0xef   :  { %2191 = vmatprep.subr.bf16.mxu1 %v2471_v31  ;;  %v2549_v30 = vld [vmem:[%s3398_s3 + $0x66c] ss:$28 sps:$4 sm:$0xff]  }
  0xf0   :  { %v2547_v31 = vld [vmem:[%s3398_s3 + $0x668] ss:$28 sps:$4 sm:$0xff]  }
  0xf1   :  { %1847 = vmatmul.mubr.bf16.vlgmr.msra.gmra.mrb[4].mxu1 %v2871_v49  ;;  %1749 = vmatpush1.bf16.msra.mxu0 %v2468_v32  ;;  %v2552_v32 = vld [vmem:[%s3398_s3 + $0x6a4] ss:$28 sps:$4 sm:$0xff]  }
  0xf2   :  { %2192 = vmatpush3.bf16.msra.mxu1 %v2472_v33  ;;  %1886 = vmatprep.mubr.bf16.mxu1 %v2886_v54  ;;  %v2550_v33 = vld [vmem:[%s3398_s3 + $0x6a0] ss:$28 sps:$4 sm:$0xff]  }
  0xf3   :  { %1750 = vmatprep.subr.bf16.mxu0 %v2475_v34  ;;  %2193 = vmatprep.subr.bf16.mxu1 %v2476_v35  ;;  %v2555_v34 = vld [vmem:[%s3398_s3 + $0x6dc] ss:$28 sps:$4 sm:$0xff]  }
  0xf4   :  { %v2553_v35 = vld [vmem:[%s3398_s3 + $0x6d8] ss:$28 sps:$4 sm:$0xff]  }
  0xf5   :  { %1751 = vmatpush1.bf16.msra.mxu0 %v2473_v36  ;;  %v3367_v36 = vld [vmem:[%s3399_s4] sm:$0x7f] }
  0xf6   :  { %2194 = vmatpush3.bf16.msra.mxu1 %v2477_v37  ;;  %1752 = vmatprep.subr.bf16.mxu0 %v2480_v38  ;;  %v384_v37 = vrot.slane %v3367_v36, %v2831_v7  ;;  %v392_v38 = vrot.slane %v3367_v36, %v2837_v9 }
  0xf7   :  { %2195 = vmatprep.subr.bf16.mxu1 %v2481_v39  ;;  %v388_v39 = vrot.slane %v3367_v36, %v2834_v8 }
  0xf9   :  { %1753 = vmatpush1.bf16.msra.mxu0 %v2478_v40  ;;  %v396_v40 = vrot.slane %v3367_v36, %v2840_v10 }
  0xfa   :  { %2196 = vmatpush3.bf16.msra.mxu1 %v2482_v41  ;;  %1754 = vmatprep.subr.bf16.mxu0 %v2485_v43 }
  0xfb   :  { %2197 = vmatprep.subr.bf16.mxu1 %v2486_v44 }
  0xfd   :  { %1755 = vmatpush1.bf16.msra.mxu0 %v2483_v45 }
  0xfe   :  { %2198 = vmatpush3.bf16.msra.mxu1 %v2487_v46  ;;  %1756 = vmatprep.subr.bf16.mxu0 %v2490_v47 }
  0xff   :  { %2199 = vmatprep.subr.bf16.mxu1 %v2491_v48 }
 0x101   :  { %1757 = vmatpush1.bf16.msra.mxu0 %v2488_v51 }
 0x102   :  { %2200 = vmatpush3.bf16.msra.mxu1 %v2492_v52  ;;  %1758 = vmatprep.subr.bf16.mxu0 %v2495_v53 }
 0x103   :  { %2201 = vmatprep.subr.bf16.mxu1 %v2496_v55 }
 0x105   :  { %1759 = vmatpush1.bf16.msra.mxu0 %v2493_v56 }
 0x106   :  { %2202 = vmatpush3.bf16.msra.mxu1 %v2497_v57  ;;  %1760 = vmatprep.subr.bf16.mxu0 %v2500_v58 }
 0x107   :  { %2203 = vmatprep.subr.bf16.mxu1 %v2501_v59 }
 0x109   :  { %1761 = vmatpush1.bf16.msra.mxu0 %v2498_v60 }
 0x10a   :  { %2204 = vmatpush3.bf16.msra.mxu1 %v2502_v42  ;;  %1762 = vmatprep.subr.bf16.mxu0 %v2505_v62 }
 0x10b   :  { %2205 = vmatprep.subr.bf16.mxu1 %v2506_v63 }
 0x10d   :  { %1763 = vmatpush1.bf16.msra.mxu0 %v2503_v0 }
 0x10e   :  { %2206 = vmatpush3.bf16.msra.mxu1 %v2507_v1  ;;  %1773 = vmatprep.subr.bf16.mxu0 %v2510_v2 }
 0x110   :  { %1765 = vmatmul.mubr.bf16.vlgmr.msra.gmra.mrb[4].mxu0 %v2871_v49  ;;  %v2519_v49 = vld [vmem:[%s3398_s3 + $0x43c] ss:$28 sps:$4 sm:$0xff]  }
 0x111   :  { %1887 = vmatmul.mubr.bf16.vlgmr.msra.gmra.mrb[8].mxu1 %v3073_v61  ;;  %1774 = vmatpush1.bf16.msra.mxu0 %v2508_v3 }
 0x112   :  { %1805 = vmatprep.mubr.bf16.mxu0 %v2886_v54  ;;  %1775 = vmatprep.subr.bf16.mxu0 %v2513_v4  ;;  %v2517_v54 = vld [vmem:[%s3398_s3 + $0x438] ss:$28 sps:$4 sm:$0xff]   ;;  %s2596_s3 = smov [#allocation2]  }
 0x113   :  { %s1936_s4 = sshll.u32 %s2596_s3, 4  ;;  %s1937_s4 = int_to_ptr.vmem [resolvable:$true] %s1936_s4 }
 0x114   :  { %s2570_s10 = scalar_lea.vmem %s1937_s4, 896  ;;  %p2575_p1 = scmp.lt.s32.totalorder %s1937_s4, %s1937_s4 }
 0x115   :  { %1776 = vmatpush1.bf16.msra.mxu0 %v2511_v50  ;;  %p2571_p0 = scmp.ne.s32.totalorder %s1937_s4, %s2570_s10  ;;  %p2576_p2 = scmp.lt.s32.totalorder %s2570_s10, %s2570_s10 }
 0x116   :  { %1777 = vmatprep.subr.bf16.mxu0 %v2516_v5 }
 0x117   :  { %p2577_p3 = por %p2576_p2, %p2575_p1 }
 0x119   :  { %1778 = vmatpush1.bf16.msra.mxu0 %v2514_v11  ;;  %p2578_p4 = pnand %p2577_p3, %p2571_p0 }
 0x11a   :  { %1779 = vmatprep.subr.bf16.mxu0 %v2519_v49 }
 0x11d   :  { %1780 = vmatpush1.bf16.msra.mxu0 %v2517_v54  ;;  %v407_v54 = vsub.s32 6, %v2828_v6 }
 0x11e   :  { %1781 = vmatprep.subr.bf16.mxu0 %v2522_v12 }
 0x11f   :  { %v408_v12 = vrot.slane %v3367_v36, %v407_v54 }
 0x121   :  { %1782 = vmatpush1.bf16.msra.mxu0 %v2520_v13 }
 0x122   :  { %1783 = vmatprep.subr.bf16.mxu0 %v2525_v14 }
 0x125   :  { %1784 = vmatpush1.bf16.msra.mxu0 %v2523_v15 }
 0x126   :  { %1785 = vmatprep.subr.bf16.mxu0 %v2528_v16 }
 0x129   :  { %1786 = vmatpush1.bf16.msra.mxu0 %v2526_v17 }
 0x12a   :  { %1787 = vmatprep.subr.bf16.mxu0 %v2531_v18 }
 0x12d   :  { %1788 = vmatpush1.bf16.msra.mxu0 %v2529_v19 }
 0x12e   :  { %1789 = vmatprep.subr.bf16.mxu0 %v2534_v20 }
 0x131   :  { %1790 = vmatpush1.bf16.msra.mxu0 %v2532_v21 }
 0x132   :  { %1791 = vmatprep.subr.bf16.mxu0 %v2537_v22 }
 0x135   :  { %1792 = vmatpush1.bf16.msra.mxu0 %v2535_v23 }
 0x136   :  { %1793 = vmatprep.subr.bf16.mxu0 %v2540_v24  ;;  %v399_v24 = vsub.s32 4, %v2828_v6 }
 0x139   :  { %1794 = vmatpush1.bf16.msra.mxu0 %v2538_v25  ;;  %v403_v25 = vsub.s32 5, %v2828_v6 }
 0x13a   :  { %1795 = vmatprep.subr.bf16.mxu0 %v2543_v26  ;;  %v400_v26 = vrot.slane %v3367_v36, %v399_v24 }
 0x13d   :  { %1796 = vmatpush1.bf16.msra.mxu0 %v2541_v27  ;;  %v404_v27 = vrot.slane %v3367_v36, %v403_v25 }
 0x13e   :  { %1797 = vmatprep.subr.bf16.mxu0 %v2546_v28 }
 0x141   :  { %1798 = vmatpush1.bf16.msra.mxu0 %v2544_v29 }
 0x142   :  { %1799 = vmatprep.subr.bf16.mxu0 %v2549_v30 }
 0x145   :  { %1800 = vmatpush1.bf16.msra.mxu0 %v2547_v31 }
 0x146   :  { %1801 = vmatprep.subr.bf16.mxu0 %v2552_v32 }
 0x149   :  { %1802 = vmatpush1.bf16.msra.mxu0 %v2550_v33 }
 0x14a   :  { %1803 = vmatprep.subr.bf16.mxu0 %v2555_v34 }
 0x14d   :  { %1804 = vmatpush1.bf16.msra.mxu0 %v2553_v35 }
 0x150   :  { %1806 = vmatmul.mubr.bf16.vlgmr.msra.gmra.mrb[4].mxu0 %v3073_v61 }
 0x1a3   :  { %v1643_v41 = vpop.f32.mrb[0].mxu0  ;;  %v1725_v43 = vpop.f32.mrb[0].mxu1 }
 0x1a4   :  { %v2213_v61 = vadd.f32 %v1643_v41, %v384_v37  ;;  %v2215_v44 = vadd.f32 %v1725_v43, %v392_v38  ;;  %v1645_v45 = vpop.f32.mrb[1].mxu0  ;;  %v1727_v46 = vpop.f32.mrb[1].mxu1 }
 0x1a5   :  { %v2214_v47 = vadd.f32 %v1645_v45, %v388_v39  ;;  %v2216_v48 = vadd.f32 %v1727_v46, %v396_v40  ;;  %v1647_v51 = vpop.f32.mrb[2].mxu0  ;;  %v1729_v52 = vpop.f32.mrb[2].mxu1 }
 0x1a6   :  { %v1894_v7 = vmul.f32 0.5, %v2213_v61  ;;  %v1896_v53 = vmul.f32 0.5, %v2215_v44  ;;  %v1648_v55 = vpop.f32.mrb[3].mxu0  ;;  %v1730_v9 = vpop.f32.mrb[3].mxu1 }
 0x1a7   :  { %v1895_v56 = vmul.f32 0.5, %v2214_v47  ;;  %v1897_v57 = vmul.f32 0.5, %v2216_v48 }
 0x1a8   :  { %2556 = vtanh.f32 %v1894_v7 }
 0x1a9   :  { %2558 = vtanh.f32 %v1896_v53 }
 0x1aa   :  { %2560 = vtanh.f32 %v1895_v56 }
 0x1ab   :  { %2562 = vtanh.f32 %v1897_v57 }
 0x1b2   :  { %v2557_v8 = vpop.eup %2556 }
 0x1b3   :  { %v2559_v10 = vpop.eup %2558  ;;  %v1908_v58 = vmul.f32 0.5, %v2557_v8 }
 0x1b4   :  { %v2561_v59 = vpop.eup %2560  ;;  %v1910_v60 = vmul.f32 0.5, %v2559_v10 }
 0x1b5   :  { %v2563_v42 = vpop.eup %2562  ;;  %v1915_v62 = vadd.f32 0.5, %v1908_v58  ;;  %v1909_v63 = vmul.f32 0.5, %v2561_v59 }
 0x1b6   :  { %v1917_v0 = vadd.f32 0.5, %v1910_v60  ;;  %v1911_v1 = vmul.f32 0.5, %v2563_v42 }
 0x1b7   :  { %1922 = vst [vmem:[#allocation2] sm:$0xff] %v1915_v62  ;;  %v1916_v2 = vadd.f32 0.5, %v1909_v63 }
 0x1b8   :  { %1924 = vst [vmem:[#allocation2 + $0x10] sm:$0xff] %v1917_v0  ;;  %v1918_v3 = vadd.f32 0.5, %v1911_v1 }
 0x1b9   :  { %1923 = vst [vmem:[#allocation2 + $0x8] sm:$0xff] %v1916_v2 }
 0x1ba   :  { %1925 = vst [vmem:[#allocation2 + $0x18] sm:$0xff] %v1918_v3 }
 0x1c4   :  { %v2185_v4 = vpop.f32.mrb[4].mxu1 }
 0x1c5   :  { %v2186_v50 = vpop.f32.mrb[5].mxu1 }
 0x1c6   :  { %v2187_v5 = vadd.f32 %v2186_v50, %v2185_v4  ;;  %v2188_v11 = vpop.f32.mrb[6].mxu1 }
 0x1c7   :  { %v2189_v49 = vpop.f32.mrb[7].mxu1 }
 0x1c8   :  { %v1849_v15 = vadd.f32 %v2187_v5, %v408_v12 }
 0x1e4   :  { %v2207_v13 = vpop.f32.mrb[8].mxu1 }
 0x1e5   :  { %v2208_v14 = vpop.f32.mrb[9].mxu1 }
 0x1e6   :  { %v2209_v16 = vadd.f32 %v2208_v14, %v2207_v13  ;;  %v2210_v17 = vpop.f32.mrb[10].mxu1 }
 0x1e7   :  { %v2211_v18 = vpop.f32.mrb[11].mxu1 }
 0x1e8   :  { %v1889_v19 = vadd.f32 %v2209_v16, %v1849_v15 }
 0x1ea   :  { %v1900_v20 = vmul.f32 0.5, %v1889_v19 }
 0x1ec   :  { %2564 = vtanh.f32 %v1900_v20 }
 0x1f6   :  { %v2565_v21 = vpop.eup %2564 }
 0x1f7   :  { %v1914_v22 = vmul.f32 0.5, %v2565_v21 }
 0x1f9   :  { %v1921_v23 = vadd.f32 0.5, %v1914_v22 }
 0x1fb   :  { %1929 = vst.msk [vmem:[#allocation2 + $0x30] sm:$0xff] %vm1928_vm0, %v1921_v23 }
 0x223   :  { %v1807_v28 = vpop.f32.mrb[4].mxu0 }
 0x224   :  { %v2217_v29 = vadd.f32 %v1807_v28, %v400_v26  ;;  %v1809_v30 = vpop.f32.mrb[5].mxu0 }
 0x225   :  { %v2218_v31 = vadd.f32 %v1809_v30, %v404_v27  ;;  %v1811_v32 = vpop.f32.mrb[6].mxu0 }
 0x226   :  { %v1898_v33 = vmul.f32 0.5, %v2217_v29  ;;  %v1812_v34 = vpop.f32.mrb[7].mxu0 }
 0x227   :  { %v1899_v35 = vmul.f32 0.5, %v2218_v31 }
 0x228   :  { %2566 = vtanh.f32 %v1898_v33 }
 0x229   :  { %2568 = vtanh.f32 %v1899_v35 }
 0x232   :  { %v2567_v37 = vpop.eup %2566 }
 0x233   :  { %v2569_v38 = vpop.eup %2568  ;;  %v1912_v39 = vmul.f32 0.5, %v2567_v37 }
 0x234   :  { %v1913_v6 = vmul.f32 0.5, %v2569_v38 }
 0x235   :  { %v1919_v40 = vadd.f32 0.5, %v1912_v39 }
 0x236   :  { %v1920_v41 = vadd.f32 0.5, %v1913_v6 }
 0x237   :  { %1926 = vst [vmem:[#allocation2 + $0x20] sm:$0xff] %v1919_v40 }
 0x238   :  { %1927 = vst [vmem:[#allocation2 + $0x28] sm:$0xff] %v1920_v41 }
 0x239   :  { %2581 = shalt.err (!%p2578_p4)
}
 0x23a   :  { %s2582_s13 = scalar_lea.hbm %s3400_s5, 896 }
 0x23b   :  { %p2583_p5 = scmp.ne.s32.totalorder %s3400_s5, %s2582_s13  ;;  %p2586_p6 = scmp.lt.u32.totalorder %s2582_s13, %s3400_s5 }
 0x23d   :  { %p2588_p7 = pnand %p2586_p6, %p2583_p5 }
 0x23f   :  { %2591 = shalt.err (!%p2588_p7)
}
 0x240   :  { %1939 = dma.vmem_to_hbm [thread:$0]  %s1937_s4, 896, %s3400_s5, [#allocation3]  }
 0x241   :  { %2592 = dma.done.wait [#allocation3], 896  }
 0x242   :  { %2593 = vsyncadd [#allocation3], 4294966400 }
 0x243   :  { %1943 = vsyncpa [#allocation3], 1 }

</bundles_post_ra>
